<compile_context>
chip_gen: v7x
topology: tpu7x:2x2x1
jax: 0.10.0
libtpu: 0.0.40
codegen_flags: <defaults>
</compile_context>

<pallas_src>
import jax
import jax.numpy as jnp
from jax.experimental import pallas as pl
from jax.experimental.pallas import tpu as pltpu


def _round_up(x: int, m: int) -> int:
    return ((x + m - 1) // m) * m


def _vmem_block_bytes(shape, itemsize) -> int:
    """Approximate VMEM footprint of one block buffer (layout-padded)."""
    rows = _round_up(shape[-2], 8) if len(shape) >= 2 else 1
    cols = _round_up(shape[-1], 128)
    lead = 1
    for d in shape[:-2]:
        lead *= int(d)
    return lead * rows * cols * itemsize


def mlp_kernel(x_ref, w1_ref, b1_ref, w2_ref, b2_ref, o_ref, acc_ref):
    """One (batch-tile, hidden-chunk) grid step of relu(x@W1 + b1) @ W2 + b2."""
    k = pl.program_id(1)

    @pl.when(k == 0)
    def _init():
        acc_ref[...] = jnp.zeros_like(acc_ref)

    # Cast activations to the matmul operand dtype in-register (no HBM copy).
    x = x_ref[...].astype(w1_ref.dtype)
    # fc1 chunk: (TB, In) @ (In, TH) -> f32 accumulation on the MXU,
    # bias-add + ReLU in f32.
    h = jnp.dot(x, w1_ref[...], preferred_element_type=jnp.float32)
    h = jnp.maximum(h + b1_ref[...], 0.0)
    # fc2 chunk: accumulate (TB, TH) @ (TH, Out_p) into the f32 accumulator.
    acc_ref[...] += jnp.dot(h.astype(w2_ref.dtype), w2_ref[...],
                            preferred_element_type=jnp.float32)

    @pl.when(k == pl.num_programs(1) - 1)
    def _finish():
        o_ref[...] = (acc_ref[...] + b2_ref[...]).astype(o_ref.dtype)


def prepare_params(w1, b1, w2, b2, *, compute_dtype=jnp.bfloat16):
    """One-time parameter prep (hoisted out of the per-step forward).

    Zero-pads the hidden and output dims up to multiples of 128 (math
    preserving: padded W1 cols / b1 give relu(0)=0, which hit zero W2 rows) and
    casts the weights to the matmul operand dtype.  Biases stay f32 for the
    f32 epilogue.  w1: (In, H), w2: (H, Out) — transposed vs. PyTorch.
    """
    In, H = w1.shape
    H2, Out = w2.shape
    assert H2 == H and b1.shape == (H,) and b2.shape == (Out,)
    H_p = _round_up(H, 128)
    Out_p = _round_up(Out, 128)
    w1_p = jnp.zeros((In, H_p), compute_dtype).at[:, :H].set(
        w1.astype(compute_dtype))
    b1_p = jnp.zeros((1, H_p), jnp.float32).at[0, :H].set(
        b1.astype(jnp.float32))
    w2_p = jnp.zeros((H_p, Out_p), compute_dtype).at[:H, :Out].set(
        w2.astype(compute_dtype))
    b2_p = jnp.zeros((1, Out_p), jnp.float32).at[0, :Out].set(
        b2.astype(jnp.float32))
    return {"w1": w1_p, "b1": b1_p, "w2": w2_p, "b2": b2_p,
            "in_size": In, "hidden": H, "out_size": Out}


def mlp_forward(x, params, *, block_b=256, vmem_budget_bytes=40 << 20):
    """MLP forward: relu(x @ w1 + b1) @ w2 + b2, with pre-prepared params."""
    w1_p, b1_p, w2_p, b2_p = (params["w1"], params["b1"],
                              params["w2"], params["b2"])
    B, In = x.shape
    assert In == params["in_size"]
    H_p = w1_p.shape[1]
    Out_p = w2_p.shape[1]
    Out = params["out_size"]
    out_dtype = x.dtype
    cbytes = jnp.dtype(w1_p.dtype).itemsize
    xbytes = jnp.dtype(x.dtype).itemsize
    obytes = jnp.dtype(out_dtype).itemsize

    # ---- batch tile: no batch padding; ragged last tile is masked on write --
    sub = 8
    if B <= sub:
        TB = B                                   # full-extent block (== B)
    else:
        TB = _round_up(min(int(block_b), B), sub)
        if pl.cdiv(B, TB) == 1:
            # >=2 grid steps so v7x can shard the batch axis over both TCs.
            TB = _round_up(-(-B // 2), sub)
    nb = pl.cdiv(B, TB)

    # ---- hidden chunk: largest 128-multiple divisor of H_p fitting VMEM -----
    k128 = H_p // 128
    candidates = sorted({d * 128 for d in range(1, k128 + 1) if k128 % d == 0},
                        reverse=True)

    def vmem_need(th, nbuf_w):
        return (2 * _vmem_block_bytes((TB, In), xbytes)         # x (2 bufs)
                + 2 * _vmem_block_bytes((TB, Out_p), obytes)    # out (2 bufs)
                + _vmem_block_bytes((TB, Out_p), 4)             # f32 acc
                + nbuf_w * (_vmem_block_bytes((In, th), cbytes)
                            + _vmem_block_bytes((1, th), 4)
                            + _vmem_block_bytes((th, Out_p), cbytes))
                + _vmem_block_bytes((1, Out_p), 4))             # b2 (1 buf)

    TH = candidates[-1]  # 128: fallback if nothing fits the budget
    for cand in candidates:
        if vmem_need(cand, 1 if cand == H_p else 2) <= vmem_budget_bytes:
            TH = cand
            break
    nh = H_p // TH
    nbuf_w = 1 if nh == 1 else 2
    need = vmem_need(TH, nbuf_w)
    vmem_limit = int(min(max(need * 1.3 + (2 << 20), 32 << 20), 64 << 20))

    def resident(shape, index_map):
        # Grid-invariant block: one VMEM buffer is enough (no double-buffer).
        return pl.BlockSpec(shape, index_map, pipeline_mode=pl.Buffered(1))

    w_spec = resident if nh == 1 else pl.BlockSpec
    in_specs = [
        pl.BlockSpec((TB, In), lambda i, k: (i, 0)),   # x, batch-tiled
        w_spec((In, TH), lambda i, k: (0, k)),         # W1 chunk
        w_spec((1, TH), lambda i, k: (0, k)),          # b1 chunk
        w_spec((TH, Out_p), lambda i, k: (k, 0)),      # W2 chunk
        resident((1, Out_p), lambda i, k: (0, 0)),     # b2 (always invariant)
    ]

    flops = 2 * B * (In * H_p + H_p * Out_p)
    bytes_accessed = (x.size * xbytes + w1_p.size * cbytes + w2_p.size * cbytes
                      + b1_p.size * 4 + b2_p.size * 4 + B * Out_p * obytes)

    out_p = pl.pallas_call(
        mlp_kernel,
        out_shape=jax.ShapeDtypeStruct((B, Out_p), out_dtype),
        grid_spec=pltpu.PrefetchScalarGridSpec(
            num_scalar_prefetch=0,
            grid=(nb, nh),
            in_specs=in_specs,
            out_specs=pl.BlockSpec((TB, Out_p), lambda i, k: (i, 0)),
            scratch_shapes=[pltpu.VMEM((TB, Out_p), jnp.float32)],
        ),
        compiler_params=pltpu.CompilerParams(
            dimension_semantics=("parallel", "arbitrary"),
            vmem_limit_bytes=vmem_limit,
        ),
        cost_estimate=pl.CostEstimate(flops=flops, transcendentals=0,
                                      bytes_accessed=bytes_accessed),
    )(x, w1_p, b1_p, w2_p, b2_p)

    # Slice off the Out padding (no-op when Out % 128 == 0).
    return out_p[:, :Out] if Out_p != Out else out_p


if __name__ == "__main__":
    # Small shapes consistent with the module's forward.
    batch = 8
    input_size = 32
    hidden_size = 64
    output_size = 16

    key = jax.random.PRNGKey(0)
    kx, kw1, kb1, kw2, kb2 = jax.random.split(key, 5)

    x = jax.random.normal(kx, (batch, input_size), dtype=jnp.float32)
    # Deterministic parameter init (PyTorch-style uniform bounds, synthetic).
    bound1 = 1.0 / (input_size ** 0.5)
    w1 = jax.random.uniform(kw1, (input_size, hidden_size), jnp.float32,
                            -bound1, bound1)
    b1 = jax.random.uniform(kb1, (hidden_size,), jnp.float32, -bound1, bound1)
    bound2 = 1.0 / (hidden_size ** 0.5)
    w2 = jax.random.uniform(kw2, (hidden_size, output_size), jnp.float32,
                            -bound2, bound2)
    b2 = jax.random.uniform(kb2, (output_size,), jnp.float32, -bound2, bound2)

    ref = jnp.maximum(x @ w1 + b1, 0.0) @ w2 + b2

    # Recommended path: bf16 matmul operands, f32 accumulation + epilogue.
    params_bf16 = prepare_params(w1, b1, w2, b2)            # one-time prep
    out_bf16 = mlp_forward(x, params_bf16)
    jax.block_until_ready(out_bf16)
    assert out_bf16.shape == (batch, output_size)
    assert jnp.allclose(out_bf16, ref, atol=2e-2, rtol=2e-2)

    # f32-operand path (matches the PyTorch module's numerics tightly).
    params_f32 = prepare_params(w1, b1, w2, b2, compute_dtype=jnp.float32)
    out_f32 = mlp_forward(x, params_f32)
    jax.block_until_ready(out_f32)
    assert out_f32.shape == (batch, output_size)
    assert jnp.allclose(out_f32, ref, atol=1e-5, rtol=1e-5)

    print("KERNEL_OK")
</pallas_src>

<mosaic_0001>
module attributes {stable_mosaic.version = 11 : i64} {
  func.func @mlp_kernel(%arg0: i32, %arg1: i32, %arg2: memref<8x32xf32, #tpu.memory_space<vmem>>, %arg3: memref<32x128xbf16, #tpu.memory_space<vmem>>, %arg4: memref<1x128xf32, #tpu.memory_space<vmem>>, %arg5: memref<128x128xbf16, #tpu.memory_space<vmem>>, %arg6: memref<1x128xf32, #tpu.memory_space<vmem>>, %arg7: memref<8x128xf32, #tpu.memory_space<vmem>>, %arg8: memref<8x128xf32, #tpu.memory_space<vmem>>) attributes {dimension_semantics = [#tpu.dimension_semantics<parallel>, #tpu.dimension_semantics<arbitrary>], iteration_bounds = array<i64: 1, 1>, scalar_prefetch = 0 : i64, scratch_operands = 1 : i64, tpu.core_type = #tpu.core_type<tc>, window_params = [{transform_indices = @transform_0, window_bounds = array<i64: 8, 32>}, {pipeline_mode = #tpu.pipeline_mode<synchronous>, transform_indices = @transform_1, window_bounds = array<i64: 32, 128>}, {pipeline_mode = #tpu.pipeline_mode<synchronous>, transform_indices = @transform_2, window_bounds = array<i64: 1, 128>}, {pipeline_mode = #tpu.pipeline_mode<synchronous>, transform_indices = @transform_3, window_bounds = array<i64: 128, 128>}, {pipeline_mode = #tpu.pipeline_mode<synchronous>, transform_indices = @transform_4, window_bounds = array<i64: 1, 128>}, {transform_indices = @transform_5, window_bounds = array<i64: 8, 128>}]} {
    %c0_i32 = arith.constant 0 : i32
    %0 = arith.cmpi eq, %arg1, %c0_i32 : i32
    %1 = arith.extui %0 : i1 to i32
    %c0_i32_0 = arith.constant 0 : i32
    %2 = arith.cmpi ne, %1, %c0_i32_0 : i32
    scf.if %2 {
      %cst_16 = arith.constant 0.000000e+00 : f32
      %21 = vector.broadcast %cst_16 : f32 to vector<8x128xf32>
      %c0_17 = arith.constant 0 : index
      %c0_18 = arith.constant 0 : index
      %22 = vector.load %arg8[%c0_17, %c0_18] : memref<8x128xf32, #tpu.memory_space<vmem>>, vector<8x128xf32>
      tpu.vector_store %arg8[%c0_17, %c0_18], %21 {strides = array<i32>} : memref<8x128xf32, #tpu.memory_space<vmem>>, vector<8x128xf32>,
    } else {
    }
    %c0 = arith.constant 0 : index
    %c0_1 = arith.constant 0 : index
    %3 = vector.load %arg2[%c0, %c0_1] : memref<8x32xf32, #tpu.memory_space<vmem>>, vector<8x32xf32>
    %4 = arith.truncf %3 : vector<8x32xf32> to vector<8x32xbf16>
    %c0_2 = arith.constant 0 : index
    %c0_3 = arith.constant 0 : index
    %5 = vector.load %arg3[%c0_2, %c0_3] : memref<32x128xbf16, #tpu.memory_space<vmem>>, vector<32x128xbf16>
    %cst = arith.constant dense<0.000000e+00> : vector<8x128xf32>
    %6 = tpu.matmul %4, %5, %cst {dimension_numbers = #tpu.dot_dimension_numbers<[1], [0], [0], [1], [0, 0, 1, 1], [], []>} : vector<8x32xbf16>, vector<32x128xbf16>, vector<8x128xf32> -> vector<8x128xf32>
    %c0_4 = arith.constant 0 : index
    %c0_5 = arith.constant 0 : index
    %7 = vector.load %arg4[%c0_4, %c0_5] : memref<1x128xf32, #tpu.memory_space<vmem>>, vector<1x128xf32>
    %8 = vector.broadcast %7 : vector<1x128xf32> to vector<8x128xf32>
    %9 = arith.addf %6, %8 : vector<8x128xf32>
    %cst_6 = arith.constant 0.000000e+00 : f32
    %10 = vector.broadcast %cst_6 : f32 to vector<8x128xf32>
    %11 = arith.maximumf %9, %10 : vector<8x128xf32>
    %c0_7 = arith.constant 0 : index
    %c0_8 = arith.constant 0 : index
    %12 = vector.load %arg8[%c0_7, %c0_8] : memref<8x128xf32, #tpu.memory_space<vmem>>, vector<8x128xf32>
    %13 = arith.truncf %11 : vector<8x128xf32> to vector<8x128xbf16>
    %c0_9 = arith.constant 0 : index
    %c0_10 = arith.constant 0 : index
    %14 = vector.load %arg5[%c0_9, %c0_10] : memref<128x128xbf16, #tpu.memory_space<vmem>>, vector<128x128xbf16>
    %cst_11 = arith.constant dense<0.000000e+00> : vector<8x128xf32>
    %15 = tpu.matmul %13, %14, %cst_11 {dimension_numbers = #tpu.dot_dimension_numbers<[1], [0], [0], [1], [0, 0, 1, 1], [], []>} : vector<8x128xbf16>, vector<128x128xbf16>, vector<8x128xf32> -> vector<8x128xf32>
    %16 = arith.addf %12, %15 : vector<8x128xf32>
    %c0_12 = arith.constant 0 : index
    %c0_13 = arith.constant 0 : index
    %17 = vector.load %arg8[%c0_12, %c0_13] : memref<8x128xf32, #tpu.memory_space<vmem>>, vector<8x128xf32>
    tpu.vector_store %arg8[%c0_12, %c0_13], %16 {strides = array<i32>} : memref<8x128xf32, #tpu.memory_space<vmem>>, vector<8x128xf32>,
    %c0_i32_14 = arith.constant 0 : i32
    %18 = arith.cmpi eq, %arg1, %c0_i32_14 : i32
    %19 = arith.extui %18 : i1 to i32
    %c0_i32_15 = arith.constant 0 : i32
    %20 = arith.cmpi ne, %19, %c0_i32_15 : i32
    scf.if %20 {
      %c0_16 = arith.constant 0 : index
      %c0_17 = arith.constant 0 : index
      %21 = vector.load %arg8[%c0_16, %c0_17] : memref<8x128xf32, #tpu.memory_space<vmem>>, vector<8x128xf32>
      %c0_18 = arith.constant 0 : index
      %c0_19 = arith.constant 0 : index
      %22 = vector.load %arg6[%c0_18, %c0_19] : memref<1x128xf32, #tpu.memory_space<vmem>>, vector<1x128xf32>
      %23 = vector.broadcast %22 : vector<1x128xf32> to vector<8x128xf32>
      %24 = arith.addf %21, %23 : vector<8x128xf32>
      %c0_20 = arith.constant 0 : index
      %c0_21 = arith.constant 0 : index
      %25 = vector.load %arg7[%c0_20, %c0_21] : memref<8x128xf32, #tpu.memory_space<vmem>>, vector<8x128xf32>
      tpu.vector_store %arg7[%c0_20, %c0_21], %24 {strides = array<i32>} : memref<8x128xf32, #tpu.memory_space<vmem>>, vector<8x128xf32>,
    } else {
    }
    return
  }
  func.func @transform_0(%arg0: i32, %arg1: i32) -> (i32, i32) {
    %c0_i32 = arith.constant 0 : i32
    %c0_i32_0 = arith.constant 0 : i32
    return %arg0, %c0_i32 : i32, i32
  }
  func.func @transform_1(%arg0: i32, %arg1: i32) -> (i32, i32) {
    %c0_i32 = arith.constant 0 : i32
    %c0_i32_0 = arith.constant 0 : i32
    return %c0_i32, %arg1 : i32, i32
  }
  func.func @transform_2(%arg0: i32, %arg1: i32) -> (i32, i32) {
    %c0_i32 = arith.constant 0 : i32
    %c0_i32_0 = arith.constant 0 : i32
    return %c0_i32, %arg1 : i32, i32
  }
  func.func @transform_3(%arg0: i32, %arg1: i32) -> (i32, i32) {
    %c0_i32 = arith.constant 0 : i32
    %c0_i32_0 = arith.constant 0 : i32
    return %arg1, %c0_i32 : i32, i32
  }
  func.func @transform_4(%arg0: i32, %arg1: i32) -> (i32, i32) {
    %c0_i32 = arith.constant 0 : i32
    %c0_i32_0 = arith.constant 0 : i32
    %c0_i32_1 = arith.constant 0 : i32
    return %c0_i32, %c0_i32_0 : i32, i32
  }
  func.func @transform_5(%arg0: i32, %arg1: i32) -> (i32, i32) {
    %c0_i32 = arith.constant 0 : i32
    %c0_i32_0 = arith.constant 0 : i32
    return %arg0, %c0_i32 : i32, i32
  }
}

</mosaic_0001>

<bundles_post_ra>
// kernel: tpu_custom_call.1
= control target key start
LH: loop header
LB: loop body
LE: loop exit
PB: predicated region body
PF: predicated region fallthrough
CT: control target
= control target key end

     0   :  { %10 = vsyncpa [#allocation4], 0  ;;  %s536_s0 = inlined_call_operand.hbm [shape: f32[8,32], index: 0, kind: input, shape index: {}]   ;;  %s537_s1 = inlined_call_operand.hbm [shape: bf16[32,128], index: 1, kind: input, shape index: {}]   ;;  %s538_s2 = inlined_call_operand.vmem [shape: f32[1,128], index: 2, kind: input, shape index: {}]   ;;  %s539_s3 = inlined_call_operand.hbm [shape: bf16[128,128], index: 3, kind: input, shape index: {}]   ;;  %s540_s4 = inlined_call_operand.vmem [shape: f32[1,128], index: 4, kind: input, shape index: {}]   ;;  %s541_s5 = inlined_call_operand.hbm [shape: f32[8,128], index: 5, kind: output, shape index: {}]  }
   0x1   :  { %11 = vsyncpa [#allocation7], 0 }
   0x2   :  { %12 = vsyncpa [#allocation5], 0  ;;  %s438_s18 = smov [#allocation6]   ;;  %s344_s22 = scalar_lea.hbm %s537_s1, 256 }
   0x3   :  { %s28_s19 = sshll.u32 %s438_s18, 4  ;;  %p345_p0 = scmp.ne.s32.totalorder %s537_s1, %s344_s22  ;;  %s29_s19 = int_to_ptr.vmem [resolvable:$true] %s28_s19 }
   0x4   :  { %p348_p1 = scmp.lt.u32.totalorder %s344_s22, %s537_s1 }
   0x6   :  { %p350_p2 = pnand %p348_p1, %p345_p0 }
   0x8   :  { %353 = shalt.err (!%p350_p2)
}
   0x9   :  { %s354_s27 = scalar_lea.vmem %s29_s19, 256  ;;  %p359_p4 = scmp.lt.s32.totalorder %s29_s19, %s29_s19 }
   0xa   :  { %p355_p3 = scmp.ne.s32.totalorder %s29_s19, %s354_s27  ;;  %p360_p5 = scmp.lt.s32.totalorder %s354_s27, %s354_s27 }
   0xc   :  { %p361_p6 = por %p360_p5, %p359_p4 }
   0xe   :  { %p362_p7 = pnand %p361_p6, %p355_p3 }
  0x10   :  { %365 = shalt.err (!%p362_p7)
}
  0x11   :  { %s439_s28 = smov 64   ;;  %s440_s29 = smov 4  }
  0x12   :  { %34 = dma.hbm_to_vmem [thread:$0]  %s537_s1, 256, %s29_s19, [#allocation7], %s439_s28, %s439_s28, %s440_s29  }
  0x13   :  { %s441_s7 = smov [#allocation3]   ;;  %s442_s9 = smov [#allocation8]  }
  0x14   :  { %s19_s8 = sshll.u32 %s441_s7, 4  ;;  %s42_s10 = sshll.u32 %s442_s9, 4  ;;  %s20_s8 = int_to_ptr.vmem [resolvable:$true] %s19_s8  ;;  %s43_s10 = int_to_ptr.vmem [resolvable:$true] %s42_s10 }
  0x15   :  { %s366_s13 = scalar_lea.hbm %s536_s0, 128 }
  0x16   :  { %p367_p8 = scmp.ne.s32.totalorder %s536_s0, %s366_s13  ;;  %p370_p9 = scmp.lt.u32.totalorder %s366_s13, %s536_s0 }
  0x18   :  { %p372_p10 = pnand %p370_p9, %p367_p8 }
  0x1a   :  { %375 = shalt.err (!%p372_p10)
}
  0x1b   :  { %s376_s1 = scalar_lea.vmem %s20_s8, 128  ;;  %p381_p12 = scmp.lt.s32.totalorder %s20_s8, %s20_s8 }
  0x1c   :  { %p377_p11 = scmp.ne.s32.totalorder %s20_s8, %s376_s1  ;;  %p382_p13 = scmp.lt.s32.totalorder %s376_s1, %s376_s1 }
  0x1e   :  { %p383_p0 = por %p382_p13, %p381_p12 }
  0x20   :  { %p384_p1 = pnand %p383_p0, %p377_p11 }
  0x22   :  { %387 = shalt.err (!%p384_p1)
}
  0x23   :  { %22 = dma.hbm_to_vmem [thread:$0]  %s536_s0, 128, %s20_s8, [#allocation4]  }
  0x24   :  { %s388_s22 = scalar_lea.hbm %s539_s3, 1024 }
  0x25   :  { %p389_p2 = scmp.ne.s32.totalorder %s539_s3, %s388_s22  ;;  %p392_p3 = scmp.lt.u32.totalorder %s388_s22, %s539_s3 }
  0x27   :  { %p394_p4 = pnand %p392_p3, %p389_p2 }
  0x29   :  { %397 = shalt.err (!%p394_p4)
}
  0x2a   :  { %s398_s27 = scalar_lea.vmem %s43_s10, 1024  ;;  %p403_p6 = scmp.lt.s32.totalorder %s43_s10, %s43_s10 }
  0x2b   :  { %p399_p5 = scmp.ne.s32.totalorder %s43_s10, %s398_s27  ;;  %p404_p7 = scmp.lt.s32.totalorder %s398_s27, %s398_s27 }
  0x2d   :  { %p405_p8 = por %p404_p7, %p403_p6 }
  0x2f   :  { %p406_p9 = pnand %p405_p8, %p399_p5 }
  0x31   :  { %409 = shalt.err (!%p406_p9)
}
  0x32   :  { %48 = dma.hbm_to_vmem [thread:$0]  %s539_s3, 1024, %s43_s10, [#allocation7], %s439_s28, %s439_s28, %s440_s29  }
  0x33   :  { %432 = dma.done.wait [#allocation4], 128  }
  0x34   :  { %433 = vsyncadd [#allocation4], 4294967168 }
  0x35   :  { %434 = dma.done.wait [#allocation7], 1280  }
  0x36   :  { %435 = vsyncadd [#allocation7], 4294966016  ;;  %v443_v0 = vmov 0.0   ;;  %vm444_vm0 = vmmov 0   ;;  %v334_v1 = vld [vmem:[#allocation6] sm:$0xff]   ;;  %v335_v2 = vld [vmem:[#allocation6 + $0x8] sm:$0xff]  }
  0x37   :  { %298 = vmatprep.subr.bf16.mxu0 %v443_v0  ;;  %302 = vmatprep.mubr.msk.bf16.mxu0 %vm444_vm0, %v443_v0  ;;  %v66_v3 = vld [vmem:[#allocation3] sm:$0xff]  ;;  %v336_v4 = vld [vmem:[#allocation8] sm:$0xff]   ;;  %vm91_vm1 = vcmask 261120   ;;  %v338_v7 = vld [vmem:[#allocation8 + $0x10] sm:$0xff]   ;;  %s445_s7 = smov [#allocation9]  }
  0x38   :  { %306 = vmatprep.subr.bf16.mxu1 %v443_v0  ;;  %322 = vmatprep.mubr.msk.bf16.mxu1 %vm444_vm0, %v443_v0  ;;  %v67_v5 = vpack.c.bf16 %v66_v3, %v66_v3  ;;  %v337_v6 = vld [vmem:[#allocation8 + $0x8] sm:$0xff]   ;;  %v339_v8 = vld [vmem:[#allocation8 + $0x18] sm:$0xff]   ;;  %v340_v9 = vld [vmem:[#allocation8 + $0x20] sm:$0xff]   ;;  %s263_s8 = sshll.u32 %s445_s7, 4  ;;  %s264_s8 = int_to_ptr.vmem [resolvable:$true] %s263_s8 }
  0x39   :  { %299 = vmatpush3.bf16.msra.mxu0 %v334_v1  ;;  %307 = vmatpush3.bf16.msra.mxu1 %v336_v4  ;;  %v341_v10 = vld [vmem:[#allocation8 + $0x28] sm:$0xff]   ;;  %v342_v11 = vld [vmem:[#allocation8 + $0x30] sm:$0xff]   ;;  %v343_v12 = vld [vmem:[#allocation8 + $0x38] sm:$0xff]   ;;  %p415_p11 = scmp.lt.s32.totalorder %s264_s8, %s264_s8 }
  0x3a   :  { %300 = vmatprep.subr.bf16.mxu0 %v443_v0  ;;  %308 = vmatprep.subr.bf16.mxu1 %v443_v0  ;;  %v273_v13 = vld [vmem:[%s538_s2] ss:$0 sm:$0xff]  ;;  %s410_s2 = scalar_lea.vmem %s264_s8, 128 }
  0x3b   :  { %v285_v21 = vld [vmem:[%s540_s4] ss:$0 sm:$0xff]  ;;  %p411_p10 = scmp.ne.s32.totalorder %s264_s8, %s410_s2  ;;  %p416_p12 = scmp.lt.s32.totalorder %s410_s2, %s410_s2 }
  0x3d   :  { %301 = vmatpush3.bf16.msra.mxu0 %v335_v2  ;;  %309 = vmatpush3.bf16.msra.mxu1 %v337_v6  ;;  %p417_p13 = por %p416_p12, %p415_p11 }
  0x3e   :  { %310 = vmatprep.subr.bf16.mxu1 %v443_v0 }
  0x3f   :  { %p418_p0 = pnand %p417_p13, %p411_p10 }
  0x40   :  { %303 = vmatmul.mubr.msk.bf16.vlgmr.msra.gmra.mrb[0].mxu0 %vm91_vm1, %v67_v5 }
  0x41   :  { %311 = vmatpush3.bf16.msra.mxu1 %v338_v7 }
  0x42   :  { %312 = vmatprep.subr.bf16.mxu1 %v443_v0 }
  0x45   :  { %313 = vmatpush3.bf16.msra.mxu1 %v339_v8 }
  0x46   :  { %314 = vmatprep.subr.bf16.mxu1 %v443_v0 }
  0x49   :  { %315 = vmatpush3.bf16.msra.mxu1 %v340_v9 }
  0x4a   :  { %316 = vmatprep.subr.bf16.mxu1 %v443_v0 }
  0x4d   :  { %317 = vmatpush3.bf16.msra.mxu1 %v341_v10 }
  0x4e   :  { %318 = vmatprep.subr.bf16.mxu1 %v443_v0 }
  0x51   :  { %319 = vmatpush3.bf16.msra.mxu1 %v342_v11 }
  0x52   :  { %320 = vmatprep.subr.bf16.mxu1 %v443_v0 }
  0x55   :  { %321 = vmatpush3.bf16.msra.mxu1 %v343_v12 }
 0x113   :  { %v129_v14 = vpop.f32.mrb[0].mxu0 }
 0x114   :  { %v130_v15 = vadd.f32 %v273_v13, %v129_v14  ;;  %v304_v16 = vpop.f32.mrb[1].mxu0 }
 0x115   :  { %v132_v17 = vpop.f32.mrb[2].mxu0 }
 0x116   :  { %v135_v18 = vmax.f32 %v130_v15, 0.0  ;;  %v305_v19 = vpop.f32.mrb[3].mxu0 }
 0x118   :  { %v137_v20 = vpack.c.bf16 %v135_v18, %v135_v18 }
 0x11a   :  { %323 = vmatmul.mubr.bf16.vlgmr.msra.gmra.mrb[0].mxu1 %v137_v20 }
 0x1ed   :  { %v236_v22 = vpop.f32.mrb[0].mxu1 }
 0x1ee   :  { %v255_v23 = vadd.f32 %v285_v21, %v236_v22  ;;  %v324_v24 = vpop.f32.mrb[1].mxu1 }
 0x1ef   :  { %v239_v25 = vpop.f32.mrb[2].mxu1 }
 0x1f0   :  { %256 = vst [vmem:[#allocation9] sm:$0xff] %v255_v23  ;;  %v325_v26 = vpop.f32.mrb[3].mxu1 }
 0x1f1   :  { %421 = shalt.err (!%p418_p0)
}
 0x1f2   :  { %s422_s4 = scalar_lea.hbm %s541_s5, 128 }
 0x1f3   :  { %p423_p1 = scmp.ne.s32.totalorder %s541_s5, %s422_s4  ;;  %p426_p2 = scmp.lt.u32.totalorder %s422_s4, %s541_s5 }
 0x1f5   :  { %p428_p3 = pnand %p426_p2, %p423_p1 }
 0x1f7   :  { %431 = shalt.err (!%p428_p3)
}
 0x1f8   :  { %266 = dma.vmem_to_hbm [thread:$0]  %s264_s8, 128, %s541_s5, [#allocation5]  }
 0x1f9   :  { %436 = dma.done.wait [#allocation5], 128  }
 0x1fa   :  { %437 = vsyncadd [#allocation5], 4294967168 }
 0x1fb   :  { %270 = vsyncpa [#allocation4], 1 }
 0x1fc   :  { %271 = vsyncpa [#allocation7], 1 }
 0x1fd   :  { %272 = vsyncpa [#allocation5], 1 }

</bundles_post_ra>
